<compile_context>
chip_gen: v5e
topology: v5e:2x2
jax: 0.10.0
libtpu: 0.0.40
codegen_flags: <defaults>
</compile_context>

<pallas_src>
import functools

import jax
import jax.numpy as jnp
from jax.experimental import pallas as pl
from jax.experimental.pallas import tpu as pltpu


# ---------------------------------------------------------------------------
# Pass 1: per-channel sum of x over (batch, time)  ->  (1, C) accumulator.
# ---------------------------------------------------------------------------
def _channel_sum_kernel(x_ref, sum_ref):
    # Output block index is constant across the grid => VMEM-resident
    # accumulator; init on the first grid step.
    @pl.when(pl.program_id(0) == 0)
    def _():
        sum_ref[...] = jnp.zeros_like(sum_ref)

    x = x_ref[...].astype(jnp.float32)          # (1, C, T) exact block, no padding
    sum_ref[...] += jnp.sum(x, axis=2)          # (1, C)


# ---------------------------------------------------------------------------
# Pass 2: elementwise gated activation, tiled over (B, C, T).
# ---------------------------------------------------------------------------
def _gate_kernel(x_ref, p_ref, o_ref, *, phi, use_skip):
    x = x_ref[...]                              # (1, c_blk, t_blk)
    p = p_ref[...]                              # (2, c_blk, 1)
    g = p[0:1]                                  # clipped gamma1 (per channel)
    bias = p[1:2]                               # freq_factor * freq_magnitude
    gate = jax.nn.sigmoid(g * x - bias)         # broadcast along lanes (time)
    act = x * gate + 0.05 * jnp.sin(phi * x)
    if use_skip:
        act = 0.95 * act + 0.05 * x
    o_ref[...] = act.astype(o_ref.dtype)


# ---------------------------------------------------------------------------
# Wrapper
# ---------------------------------------------------------------------------
def fftgate_forward(x, hist, gamma1, *, phi=0.1, epoch=0, use_skip=False):
    """x: (B, C, T) — PyTorch layout; hist: (history_len, C); gamma1: (1,).

    Returns (activation, new_history), matching FFTGate.forward +
    update_history of the PyTorch module."""
    B, C, T = x.shape
    TH, Ch = hist.shape
    assert Ch == C

    # Host-side scalar schedule (same python math as the PyTorch module).
    freq_factor = min(0.3 + 0.007 * epoch, 0.8)
    smoothing = max(0.1, 1.0 / (epoch + 10))

    vmem_limit = 32 * 1024 * 1024   # safe on v5e/v6e (128 MiB) and v7x (64 MiB)

    # ---- Pass 1: ch_mean = mean(x, axis=(0, 2)) via Pallas accumulator -----
    ch_sums = pl.pallas_call(
        _channel_sum_kernel,
        out_shape=jax.ShapeDtypeStruct((1, C), jnp.float32),
        grid=(B,),
        in_specs=[pl.BlockSpec((1, C, T), lambda b: (b, 0, 0))],
        out_specs=pl.BlockSpec((1, C), lambda b: (0, 0)),
        compiler_params=pltpu.CompilerParams(
            dimension_semantics=("arbitrary",),
            vmem_limit_bytes=vmem_limit),
    )(x)
    ch_mean = ch_sums[0] / float(B * T)                         # (C,)

    # ---- History shift + spectral magnitude (tiny (TH, C) math, plain JAX) -
    # Hoisted out of the kernel: (12 x C) data, <2% MXU utilization in-kernel.
    new_hist = jnp.concatenate([hist[1:], ch_mean[None, :]], axis=0)
    fm = jnp.abs(jnp.fft.fft(new_hist, axis=0)).mean(axis=0)    # (C,)
    fm = jnp.clip(fm, 0.05, 1.5)
    fm = (1.0 - smoothing) * fm + smoothing * jnp.mean(fm)

    g = jnp.clip(gamma1[0], 0.1, 6.0)
    params = jnp.stack(
        [jnp.broadcast_to(g, (C,)).astype(jnp.float32),
         (freq_factor * fm).astype(jnp.float32)],
        axis=0)[..., None]                                       # (2, C, 1)

    # ---- Pass 2: tiled, pipelined elementwise gate in native (B, C, T) -----
    # Sublane dim = channels (full C or 512-aligned), lane dim = time (full T
    # or a 512-wide multiple of 128).  Each f32 block is <= 1 MiB, so in+out
    # with double buffering stays far under the VMEM budget on all generations.
    c_blk = C if C <= 512 else 512
    t_blk = T if T <= 512 else 512
    grid = (B, pl.cdiv(C, c_blk), pl.cdiv(T, t_blk))

    kern = functools.partial(_gate_kernel, phi=float(phi), use_skip=bool(use_skip))
    act = pl.pallas_call(
        kern,
        out_shape=jax.ShapeDtypeStruct((B, C, T), x.dtype),
        grid=grid,
        in_specs=[
            pl.BlockSpec((1, c_blk, t_blk), lambda b, ci, ti: (b, ci, ti)),
            pl.BlockSpec((2, c_blk, 1), lambda b, ci, ti: (0, ci, 0)),
        ],
        out_specs=pl.BlockSpec((1, c_blk, t_blk), lambda b, ci, ti: (b, ci, ti)),
        compiler_params=pltpu.CompilerParams(
            dimension_semantics=("parallel", "parallel", "parallel"),
            vmem_limit_bytes=vmem_limit),
    )(x, params)

    return act, new_hist


# ---------------------------------------------------------------------------
# Pure-JAX reference mirroring the PyTorch forward.
# ---------------------------------------------------------------------------
def fftgate_reference(x, hist, gamma1, *, phi=0.1, epoch=0, use_skip=False):
    ch_mean = jnp.mean(x, axis=(0, 2))                          # (C,)
    new_hist = jnp.concatenate([hist[1:], ch_mean[None, :]], axis=0)
    fm = jnp.abs(jnp.fft.fft(new_hist, axis=0)).mean(axis=0)
    fm = jnp.clip(fm, 0.05, 1.5)
    smoothing = max(0.1, 1.0 / (epoch + 10))
    fm = (1.0 - smoothing) * fm + smoothing * fm.mean()
    fm = fm.reshape(1, -1, 1)
    g = jnp.clip(gamma1[0], 0.1, 6.0)
    ff = min(0.3 + 0.007 * epoch, 0.8)
    gate = jax.nn.sigmoid(g * x - ff * fm)
    act = x * gate + 0.05 * jnp.sin(phi * x)
    if use_skip:
        act = 0.95 * act + 0.05 * x
    return act, new_hist


if __name__ == "__main__":
    key = jax.random.PRNGKey(0)
    kx, kh = jax.random.split(key)

    B, C, T = 2, 32, 16          # batch, channels (gated axis 1), seq length
    TH = 12                      # history_len

    x = jax.random.normal(kx, (B, C, T), dtype=jnp.float32)
    hist = 0.5 * jax.random.normal(kh, (TH, C), dtype=jnp.float32)
    gamma1 = jnp.full((1,), 1.5, jnp.float32)   # nn.Parameter(gamma1=1.5)

    for epoch, use_skip in [(0, False), (3, True)]:
        act, new_hist = fftgate_forward(x, hist, gamma1, phi=0.1,
                                        epoch=epoch, use_skip=use_skip)
        act = jax.block_until_ready(act)
        new_hist = jax.block_until_ready(new_hist)

        act_ref, hist_ref = fftgate_reference(x, hist, gamma1, phi=0.1,
                                              epoch=epoch, use_skip=use_skip)
        assert jnp.allclose(act, act_ref, atol=1e-4, rtol=1e-4), \
            f"act max err {float(jnp.max(jnp.abs(act - act_ref)))}"
        assert jnp.allclose(new_hist, hist_ref, atol=1e-5, rtol=1e-5), \
            f"hist max err {float(jnp.max(jnp.abs(new_hist - hist_ref)))}"

    # TODO(synk): decay_spectral_history / sigmoid_blended_decay are host-side
    # training-loop buffer decays (not part of forward) and are not kernelized.
    print("KERNEL_OK")
</pallas_src>

<mosaic_0001>
module attributes {stable_mosaic.version = 11 : i64} {
  func.func @_channel_sum_kernel(%arg0: i32, %arg1: memref<1x32x16xf32, #tpu.memory_space<vmem>>, %arg2: memref<1x32xf32, #tpu.memory_space<vmem>>) attributes {dimension_semantics = [#tpu.dimension_semantics<arbitrary>], iteration_bounds = array<i64: 2>, scalar_prefetch = 0 : i64, scratch_operands = 0 : i64, tpu.core_type = #tpu.core_type<tc>, window_params = [{transform_indices = @transform_0, window_bounds = array<i64: 1, 32, 16>}, {pipeline_mode = #tpu.pipeline_mode<synchronous>, transform_indices = @transform_1, window_bounds = array<i64: 1, 32>}]} {
    %c0_i32 = arith.constant 0 : i32
    %0 = arith.cmpi eq, %arg0, %c0_i32 : i32
    %1 = arith.extui %0 : i1 to i32
    %c0_i32_0 = arith.constant 0 : i32
    %2 = arith.cmpi ne, %1, %c0_i32_0 : i32
    scf.if %2 {
      %cst_7 = arith.constant 0.000000e+00 : f32
      %8 = vector.broadcast %cst_7 : f32 to vector<1x32xf32>
      %c0_8 = arith.constant 0 : index
      %c0_9 = arith.constant 0 : index
      %9 = vector.load %arg2[%c0_8, %c0_9] : memref<1x32xf32, #tpu.memory_space<vmem>>, vector<1x32xf32>
      tpu.vector_store %arg2[%c0_8, %c0_9], %8 {strides = array<i32>} : memref<1x32xf32, #tpu.memory_space<vmem>>, vector<1x32xf32>,
    } else {
    }
    %c0 = arith.constant 0 : index
    %c0_1 = arith.constant 0 : index
    %c0_2 = arith.constant 0 : index
    %3 = vector.load %arg1[%c0, %c0_1, %c0_2] : memref<1x32x16xf32, #tpu.memory_space<vmem>>, vector<1x32x16xf32>
    %c0_3 = arith.constant 0 : index
    %c0_4 = arith.constant 0 : index
    %4 = vector.load %arg2[%c0_3, %c0_4] : memref<1x32xf32, #tpu.memory_space<vmem>>, vector<1x32xf32>
    %cst = arith.constant dense<0.000000e+00> : vector<1x32xf32>
    %5 = vector.multi_reduction <add>, %3, %cst [2] : vector<1x32x16xf32> to vector<1x32xf32>
    %6 = arith.addf %4, %5 : vector<1x32xf32>
    %c0_5 = arith.constant 0 : index
    %c0_6 = arith.constant 0 : index
    %7 = vector.load %arg2[%c0_5, %c0_6] : memref<1x32xf32, #tpu.memory_space<vmem>>, vector<1x32xf32>
    tpu.vector_store %arg2[%c0_5, %c0_6], %6 {strides = array<i32>} : memref<1x32xf32, #tpu.memory_space<vmem>>, vector<1x32xf32>,
    return
  }
  func.func @transform_0(%arg0: i32) -> (i32, i32, i32) {
    %c0_i32 = arith.constant 0 : i32
    %c0_i32_0 = arith.constant 0 : i32
    %c0_i32_1 = arith.constant 0 : i32
    return %arg0, %c0_i32, %c0_i32_0 : i32, i32, i32
  }
  func.func @transform_1(%arg0: i32) -> (i32, i32) {
    %c0_i32 = arith.constant 0 : i32
    %c0_i32_0 = arith.constant 0 : i32
    %c0_i32_1 = arith.constant 0 : i32
    return %c0_i32, %c0_i32_0 : i32, i32
  }
}

</mosaic_0001>

<bundles_post_ra>
// kernel: tpu_custom_call.1
= control target key start
LH: loop header
LB: loop body
LE: loop exit
PB: predicated region body
PF: predicated region fallthrough
CT: control target
= control target key end

     0   :  { %6 = vsyncpa [#allocation3], 0  ;;  %s370_s6 = smov 0   ;;  %s393_s0 = inlined_call_operand.vmem [shape: f32[2,32,16], index: 0, kind: input, shape index: {}]   ;;  %s394_s1 = inlined_call_operand.hbm [shape: f32[1,32], index: 1, kind: output, shape index: {}]  }
   0x1 LB: > { %s376_s7 = sadd.s32 4294967295, %s355_s6   ;;  %p288_p0 = scmp.ge.s32.totalorder %s355_s6, 1  ;;  %s355_s6 = sphi %s370_s6, %s12_s6  }
   0x2   : > { %p83_p1 = scmp.lt.s32.totalorder %s355_s6, 3 }
   0x4   : > { %p84_p2 = pnand %p288_p0, %p83_p1 }
   0x5   : > { %p98_p3 = scmp.lt.s32.totalorder (!%p84_p2), %s376_s7, 1  ;;  %p291_p4 = scmp.ne.s32.totalorder (!%p84_p2), %s376_s7, 0 }
   0x6   : > { %87 = sbr.rel (%p84_p2) target bundleno = 323 (0x143), region = 24 }
   0xb   : > { %s99_s8 = scalar_select %p98_p3, %s376_s7, 1 }
   0xc   : > { %106 = sbr.rel (%p291_p4) target bundleno = 19 (0x13), region = 28 }
   0xd   : > { %s296_s9 = sshll.u32 %s99_s8, 5 }
   0xe   : > { %s102_s12 = scalar_lea.vmem %s393_s0, %s296_s9 }
  0x11   : > { %vm107_vm0 = vcmask 253952   ;;  %v357_v0 = vmov 0.0  }
  0x12   : > { %108 = vst.msk [vmem:[#allocation2] sm:$0x1] %vm107_vm0, %v357_v0 }
  0x13 PF: > { %v109_v1 = vld [vmem:[%s102_s12] sm:$0xff]  ;;  %vm114_vm1 = vcmask 130048   ;;  %v111_v2 = vld [vmem:[%s102_s12 + $0x10] sm:$0xff]  ;;  %v110_v5 = vld [vmem:[%s102_s12 + $0x8] sm:$0xff]  ;;  %v358_v9 = vmov 0   ;;  %v218_v51 = vlaneseq  ;;  %vm223_vm2 = vcmask 130112  }
  0x14   : > { %v115_v3 = vsel %vm114_vm1, %v109_v1, 0.0  ;;  %v121_v4 = vsel %vm114_vm1, %v111_v2, 0.0  ;;  %v112_v6 = vld [vmem:[%s102_s12 + $0x18] sm:$0xff]  ;;  %v118_v7 = vsel %vm114_vm1, %v110_v5, 0.0  ;;  %314 = vset.pattern.permute.xlu2 %v358_v9  ;;  %315 = vset.pattern.permute.xlu0 %v358_v9  ;;  %vm227_vm3 = vcmask 195712   ;;  %s359_s13 = smov [#allocation2]  }
  0x15   : > { %116 = vadd.xlane.f32.xlu0 %v115_v3  ;;  %122 = vadd.xlane.f32.xlu1 %v121_v4  ;;  %v124_v8 = vsel %vm114_vm1, %v112_v6, 0.0  ;;  %v219_v52 = vand.u32 127, %v218_v51  ;;  %vm231_vm4 = vcmask 261312   ;;  %s243_s14 = sshll.u32 %s359_s13, 4  ;;  %s245_s17 = sshll.u32 %s394_s1, 4  ;;  %vm235_vm5 = vcmask 253952   ;;  %s244_s14 = int_to_ptr.vmem [resolvable:$true] %s243_s14  ;;  %s246_s17 = int_to_ptr.hbm [resolvable:$true] %s245_s17 }
  0x16   : > { %316 = vset.pattern.permute.xlu1 %v358_v9  ;;  %p301_p5 = scmp.eq.s32.totalorder %s376_s7, 1 }
  0x17   : > { %v221_v53 = vadd.s32 4294967288, %v219_v52  ;;  %v225_v55 = vadd.s32 4294967280, %v219_v52  ;;  %v229_v58 = vadd.s32 4294967272, %v219_v52 }
  0x19   : > { %v113_v0 = vld [vmem:[#allocation2] sm:$0x1] }
  0x1d   : > { %119 = vadd.xlane.f32.xlu0 %v118_v7  ;;  %125 = vadd.xlane.f32.xlu1 %v124_v8 }
  0x88   : > { %v117_v10 = vpop.xlane.xlu0 %116  ;;  %v123_v29 = vpop.xlane.xlu1 %122 }
  0x89   : > { %v131_v11 = vperm.slane %v117_v10, 0  ;;  %v132_v12 = vperm.slane %v117_v10, 1  ;;  %v133_v13 = vperm.slane %v117_v10, 2  ;;  %v134_v14 = vperm.slane %v117_v10, 3 }
  0x8a   : > { %v135_v15 = vperm.slane %v117_v10, 4  ;;  %v136_v16 = vperm.slane %v117_v10, 5  ;;  %v137_v17 = vperm.slane %v117_v10, 6  ;;  %v138_v18 = vperm.slane %v117_v10, 7 }
  0x8b   : > { %163 = vst [vmem:[#allocation1] ss:$9 sm:$0xff] %v131_v11  ;;  %v147_v30 = vperm.slane %v123_v29, 0  ;;  %v148_v31 = vperm.slane %v123_v29, 1  ;;  %v149_v32 = vperm.slane %v123_v29, 2  ;;  %v150_v34 = vperm.slane %v123_v29, 3 }
  0x8c   : > { %165 = vst [vmem:[#allocation1 + $0x1] ss:$9 sm:$0xff] %v132_v12  ;;  %v151_v35 = vperm.slane %v123_v29, 4  ;;  %v152_v36 = vperm.slane %v123_v29, 5  ;;  %v153_v37 = vperm.slane %v123_v29, 6  ;;  %v154_v38 = vperm.slane %v123_v29, 7 }
  0x8d   : > { %167 = vst [vmem:[#allocation1 + $0x2] ss:$9 sm:$0xff] %v133_v13 }
  0x8e   : > { %169 = vst [vmem:[#allocation1 + $0x3] ss:$9 sm:$0xff] %v134_v14 }
  0x8f   : > { %171 = vst [vmem:[#allocation1 + $0x4] ss:$9 sm:$0xff] %v135_v15 }
  0x90   : > { %173 = vst [vmem:[#allocation1 + $0x5] ss:$9 sm:$0xff] %v136_v16  ;;  %v120_v19 = vpop.xlane.xlu0 %119  ;;  %v126_v39 = vpop.xlane.xlu1 %125 }
  0x91   : > { %175 = vst [vmem:[#allocation1 + $0x6] ss:$9 sm:$0xff] %v137_v17  ;;  %v139_v20 = vperm.slane %v120_v19, 0  ;;  %v140_v21 = vperm.slane %v120_v19, 1  ;;  %v141_v22 = vperm.slane %v120_v19, 2  ;;  %v142_v24 = vperm.slane %v120_v19, 3 }
  0x92   : > { %177 = vst [vmem:[#allocation1 + $0x7] ss:$9 sm:$0xff] %v138_v18  ;;  %v143_v25 = vperm.slane %v120_v19, 4  ;;  %v144_v26 = vperm.slane %v120_v19, 5  ;;  %v145_v27 = vperm.slane %v120_v19, 6  ;;  %v146_v28 = vperm.slane %v120_v19, 7 }
  0x93   : > { %v155_v40 = vperm.slane %v126_v39, 0  ;;  %v156_v41 = vperm.slane %v126_v39, 1  ;;  %v157_v42 = vperm.slane %v126_v39, 2  ;;  %v158_v43 = vperm.slane %v126_v39, 3 }
  0x94   : > { %v159_v45 = vperm.slane %v126_v39, 4  ;;  %v160_v46 = vperm.slane %v126_v39, 5  ;;  %v161_v47 = vperm.slane %v126_v39, 6  ;;  %v162_v48 = vperm.slane %v126_v39, 7 }
  0x99   : > { %v178_v23 = vld [vmem:[#allocation1] sm:$0xff] }
  0x9a   : > { %179 = vst [vmem:[#allocation1] ss:$9 sm:$0xff] %v139_v20  ;;  %207 = vperm.xlu2 %314, %v178_v23  }
  0x9b   : > { %180 = vst [vmem:[#allocation1 + $0x1] ss:$9 sm:$0xff] %v140_v21 }
  0x9c   : > { %181 = vst [vmem:[#allocation1 + $0x2] ss:$9 sm:$0xff] %v141_v22 }
  0x9d   : > { %182 = vst [vmem:[#allocation1 + $0x3] ss:$9 sm:$0xff] %v142_v24 }
  0x9e   : > { %183 = vst [vmem:[#allocation1 + $0x4] ss:$9 sm:$0xff] %v143_v25 }
  0x9f   : > { %184 = vst [vmem:[#allocation1 + $0x5] ss:$9 sm:$0xff] %v144_v26 }
  0xa0   : > { %185 = vst [vmem:[#allocation1 + $0x6] ss:$9 sm:$0xff] %v145_v27 }
  0xa1   : > { %186 = vst [vmem:[#allocation1 + $0x7] ss:$9 sm:$0xff] %v146_v28 }
  0xa8   : > { %v187_v33 = vld [vmem:[#allocation1] sm:$0xff] }
  0xa9   : > { %188 = vst [vmem:[#allocation1] ss:$9 sm:$0xff] %v147_v30  ;;  %210 = vperm.xlu2 %314, %v187_v33  }
  0xaa   : > { %189 = vst [vmem:[#allocation1 + $0x1] ss:$9 sm:$0xff] %v148_v31 }
  0xab   : > { %190 = vst [vmem:[#allocation1 + $0x2] ss:$9 sm:$0xff] %v149_v32 }
  0xac   : > { %191 = vst [vmem:[#allocation1 + $0x3] ss:$9 sm:$0xff] %v150_v34 }
  0xad   : > { %192 = vst [vmem:[#allocation1 + $0x4] ss:$9 sm:$0xff] %v151_v35 }
  0xae   : > { %193 = vst [vmem:[#allocation1 + $0x5] ss:$9 sm:$0xff] %v152_v36 }
  0xaf   : > { %194 = vst [vmem:[#allocation1 + $0x6] ss:$9 sm:$0xff] %v153_v37 }
  0xb0   : > { %195 = vst [vmem:[#allocation1 + $0x7] ss:$9 sm:$0xff] %v154_v38 }
  0xb7   : > { %v196_v44 = vld [vmem:[#allocation1] sm:$0xff] }
  0xb8   : > { %213 = vperm.xlu0 %315, %v196_v44   ;;  %197 = vst [vmem:[#allocation1] ss:$9 sm:$0xff] %v155_v40 }
  0xb9   : > { %198 = vst [vmem:[#allocation1 + $0x1] ss:$9 sm:$0xff] %v156_v41 }
  0xba   : > { %199 = vst [vmem:[#allocation1 + $0x2] ss:$9 sm:$0xff] %v157_v42 }
  0xbb   : > { %200 = vst [vmem:[#allocation1 + $0x3] ss:$9 sm:$0xff] %v158_v43 }
  0xbc   : > { %201 = vst [vmem:[#allocation1 + $0x4] ss:$9 sm:$0xff] %v159_v45 }
  0xbd   : > { %202 = vst [vmem:[#allocation1 + $0x5] ss:$9 sm:$0xff] %v160_v46 }
  0xbe   : > { %203 = vst [vmem:[#allocation1 + $0x6] ss:$9 sm:$0xff] %v161_v47 }
  0xbf   : > { %204 = vst [vmem:[#allocation1 + $0x7] ss:$9 sm:$0xff] %v162_v48 }
  0xc6   : > { %v205_v49 = vld [vmem:[#allocation1] sm:$0xff] }
  0xc7   : > { %216 = vperm.xlu1 %316, %v205_v49  }
  0xf4   : > { %v208_v50 = vpop.permute.xlu2 %207 }
  0xf5   : > { %v220_v60 = vperm.slane %v208_v50, %v219_v52 }
 0x103   : > { %v211_v54 = vpop.permute.xlu2 %210 }
 0x104   : > { %v222_v57 = vperm.slane %v211_v54, %v221_v53 }
 0x106   : > { %v224_v62 = vsel %vm223_vm2, %v222_v57, %v220_v60 }
 0x12a   : > { %v214_v56 = vpop.permute.xlu0 %213 }
 0x12b   : > { %v226_v59 = vperm.slane %v214_v56, %v225_v55 }
 0x12d   : > { %v228_v1 = vsel %vm227_vm3, %v226_v59, %v224_v62 }
 0x139   : > { %v217_v61 = vpop.permute.xlu1 %216 }
 0x13a   : > { %v230_v63 = vperm.slane %v217_v61, %v229_v58 }
 0x13c   : > { %v232_v2 = vsel %vm231_vm4, %v230_v63, %v228_v1 }
 0x13d   : > { %v234_v3 = vadd.f32 %v232_v2, %v113_v0 }
 0x13f   : > { %236 = vst.msk [vmem:[#allocation2] sm:$0x1] %vm235_vm5, %v234_v3 }
 0x140   : > { %298 = dma.vmem_to_hbm [thread:$0]  (%p301_p5), %s244_s14, 16, %s246_s17, [#allocation3]  }
 0x141   : > { %350 = dma.done.wait (%p301_p5), [#allocation3], 16  }
 0x142   : > { %352 = vsyncadd (%p301_p5), [#allocation3], 4294967280 }
 0x143 PF: > { %s12_s6 = sadd.s32 1, %s355_s6  }
 0x144   : > { %p9_p6 = scmp.ge.s32.totalorder %s12_s6, 4  }
 0x146   :  { %11 = sbr.rel (!%p9_p6) target bundleno = 1 (0x1), region = 62 }
 0x14b   :  { %259 = vsyncpa [#allocation3], 1 }
 0x14c   :  { %261 = vsyncpa [#allocation3 + $0x1], 1 }

</bundles_post_ra>
